<compile_context>
chip_gen: v7x
topology: tpu7x:2x2x1
jax: 0.10.0
libtpu: 0.0.40
codegen_flags: <defaults>
</compile_context>

<pallas_src>
import jax
import jax.numpy as jnp
from jax.experimental import pallas as pl
from jax.experimental.pallas import tpu as pltpu

# ---------------- config (mirrors `args`) ----------------
HIDDEN = 96                      # args.hidden_dim
INTD = HIDDEN // 3               # 32
MAX_SEQ = 8                      # sequence length of inputs
N_TEST = 10                      # args.n_test
N_QUESTIONS = 10                 # args.n_questions
N_TAG = 5                        # args.n_tag
N_ELAPSED_QUESTION = 20          # args.n_elapsed_question
MODEL = "lstm"                   # not 'bert'/'lstm_attn' -> forward returns (X, batch_size)
# TODO(synk): nn.Dropout(args.dropout) is stochastic; implemented as identity (eval semantics).

# vocab sizes in concat order: [interaction, test, question, tag, elapsed_question]
VOCABS = (3, N_TEST + 1, N_QUESTIONS + 1, N_TAG + 1, N_ELAPSED_QUESTION + 1)
_offs, _acc = [], 0
for _v in VOCABS:
    _offs.append(_acc)
    _acc += _v
OFFSETS = tuple(_offs)           # (0, 3, 14, 25, 31)
BIAS_ROW = _acc                  # 52 -> bias folded into the packed table at this row
PACKED_K = 128                   # packed vocab axis (52 real rows + bias), padded to lane width
PACKED_N = 128                   # output lanes (96 real), padded for unmasked stores
N_IDX_COLS = 8                   # 5 features + bias lane + 2 sentinel cols (-1 -> never hot)
N_HOT = 6                        # columns that can actually light a lane
TM_MAX = 512                     # row-block size cap (multiple of 8)


def _round_up(x, m):
    return ((x + m - 1) // m) * m


# ---------------- fused Pallas kernel ----------------
def _base_model_kernel(idx_ref, p_ref, o_ref):
    """o = multihot(idx) @ P_packed.

    idx_ref: (TM, 8)  int32   -- 5 offset-shifted feature indices, BIAS_ROW, -1, -1
    p_ref:   (128, 128) f32   -- offset-packed, weight-fused, bias-folded table
    o_ref:   (TM, 128) f32    -- lane-dense output slab (first 96 cols are real)
    """
    idx = idx_ref[...]                                        # (TM, 8)
    rows = idx_ref.shape[0]
    lane = jax.lax.broadcasted_iota(jnp.int32, (rows, PACKED_K), 1)   # hoisted, reused 6x
    mh = jnp.zeros((rows, PACKED_K), jnp.float32)
    for j in range(N_HOT):                                    # static unrolled: 5 feats + bias
        mh = mh + (lane == idx[:, j:j + 1]).astype(jnp.float32)
    # Single MXU pass: (TM,128) @ (128,128).
    o_ref[...] = jnp.dot(mh, p_ref[...], preferred_element_type=jnp.float32)


# ---------------- wrapper ----------------
@jax.jit
def _base_model_apply(p_packed, interaction, test, question, tag, elapsed_question):
    B, S = interaction.shape
    N = B * S

    def col(x, off):
        return x.reshape(N).astype(jnp.int32) + off

    idx = jnp.stack(
        [col(interaction, OFFSETS[0]),
         col(test, OFFSETS[1]),
         col(question, OFFSETS[2]),
         col(tag, OFFSETS[3]),
         col(elapsed_question, OFFSETS[4]),
         jnp.full((N,), BIAS_ROW, jnp.int32),   # always-hot bias row
         jnp.full((N,), -1, jnp.int32),         # sentinel (never matches a lane)
         jnp.full((N,), -1, jnp.int32)],
        axis=1)                                  # (N, 8) int32 -- one packed index input

    tm = min(TM_MAX, _round_up(N, 8))
    n_pad = _round_up(N, tm)
    if n_pad != N:
        idx = jnp.pad(idx, ((0, n_pad - N), (0, 0)), constant_values=-1)

    out = pl.pallas_call(
        _base_model_kernel,
        out_shape=jax.ShapeDtypeStruct((n_pad, PACKED_N), jnp.float32),
        grid_spec=pltpu.PrefetchScalarGridSpec(
            num_scalar_prefetch=0,
            grid=(n_pad // tm,),
            in_specs=[pl.BlockSpec((tm, N_IDX_COLS), lambda i: (i, 0)),
                      pl.BlockSpec((PACKED_K, PACKED_N), lambda i: (0, 0))],
            out_specs=pl.BlockSpec((tm, PACKED_N), lambda i: (i, 0)),
        ),
        compiler_params=pltpu.CompilerParams(
            dimension_semantics=("parallel",)),   # shards rows across TCs on v7x
    )(idx, p_packed)

    return out[:N, :HIDDEN].reshape(B, S, HIDDEN)


def base_model_forward(params, inputs):
    test, question, tag, _, elapsed_question, mask, interaction, _ = inputs
    X = _base_model_apply(params["p_packed"], interaction, test, question, tag,
                          elapsed_question)
    batch_size = interaction.shape[0]
    if MODEL in ("bert", "lstm_attn"):
        return X, batch_size, mask
    return X, batch_size


# ---------------- pure-JAX reference (for correctness check) ----------------
def reference_forward(params, inputs):
    test, question, tag, _, elapsed_question, mask, interaction, _ = inputs
    embed = jnp.concatenate([
        params["emb_interaction"][interaction],
        params["emb_test"][test],
        params["emb_question"][question],
        params["emb_tag"][tag],
        params["emb_elapsed_question"][elapsed_question],
    ], axis=2)                                               # (B, S, 5*intd)
    return (jnp.dot(embed, params["comb_w"].T,
                    precision=jax.lax.Precision.HIGHEST)
            + params["comb_b"])


# ---------------- deterministic parameter init ----------------
def make_params(key):
    ks = jax.random.split(key, 7)
    s = 0.05
    tabs = [
        s * jax.random.normal(ks[0], (VOCABS[0], INTD), jnp.float32),   # interaction
        s * jax.random.normal(ks[1], (VOCABS[1], INTD), jnp.float32),   # test
        s * jax.random.normal(ks[2], (VOCABS[2], INTD), jnp.float32),   # question
        s * jax.random.normal(ks[3], (VOCABS[3], INTD), jnp.float32),   # tag
        s * jax.random.normal(ks[4], (VOCABS[4], INTD), jnp.float32),   # elapsed_question
    ]
    comb_w = s * jax.random.normal(ks[5], (HIDDEN, 5 * INTD), jnp.float32)  # nn.Linear weight
    comb_b = s * jax.random.normal(ks[6], (HIDDEN,), jnp.float32)
    w_t = comb_w.T                                                       # (5*intd, hidden)

    # One-time constant fusion: P_i = E_i @ W_i, packed at per-feature row offsets,
    # bias folded in as an extra row, padded to a lane-dense (128, 128) slab.
    # (Kept in f32; bf16 table would halve DMA but relaxes the 1e-5 parity check.)
    p = jnp.zeros((PACKED_K, PACKED_N), jnp.float32)
    for i, t in enumerate(tabs):
        wi = w_t[i * INTD:(i + 1) * INTD, :]                             # (intd, hidden)
        pi = jnp.dot(t, wi, precision=jax.lax.Precision.HIGHEST)         # (V_i, hidden)
        p = p.at[OFFSETS[i]:OFFSETS[i] + VOCABS[i], :HIDDEN].set(pi)
    p = p.at[BIAS_ROW, :HIDDEN].set(comb_b)

    return {
        "emb_interaction": tabs[0], "emb_test": tabs[1], "emb_question": tabs[2],
        "emb_tag": tabs[3], "emb_elapsed_question": tabs[4],
        "comb_w": comb_w, "comb_b": comb_b,
        "p_packed": p,
    }


# ---------------- main ----------------
if __name__ == "__main__":
    B, S = 2, MAX_SEQ
    root = jax.random.PRNGKey(0)
    kp, k1, k2, k3, k4, k5 = jax.random.split(root, 6)

    params = make_params(kp)

    interaction = jax.random.randint(k1, (B, S), 0, 3, dtype=jnp.int32)
    test = jax.random.randint(k2, (B, S), 0, N_TEST + 1, dtype=jnp.int32)
    question = jax.random.randint(k3, (B, S), 0, N_QUESTIONS + 1, dtype=jnp.int32)
    tag = jax.random.randint(k4, (B, S), 0, N_TAG + 1, dtype=jnp.int32)
    elapsed_question = jax.random.randint(k5, (B, S), 0, N_ELAPSED_QUESTION + 1,
                                          dtype=jnp.int32)
    correct = jnp.zeros((B, S), jnp.int32)
    mask = jnp.ones((B, S), jnp.int32)
    extra = jnp.zeros((B, S), jnp.int32)

    inputs = (test, question, tag, correct, elapsed_question, mask, interaction, extra)

    X, batch_size = base_model_forward(params, inputs)
    X = jax.block_until_ready(X)

    assert X.shape == (B, S, HIDDEN)
    assert batch_size == B
    assert bool(jnp.all(jnp.isfinite(X)))

    X_ref = reference_forward(params, inputs)
    assert bool(jnp.allclose(X, X_ref, atol=1e-5, rtol=1e-5))

    print("KERNEL_OK")
</pallas_src>

<mosaic_0001>
module attributes {stable_mosaic.version = 11 : i64} {
  func.func @_base_model_kernel(%arg0: i32, %arg1: memref<16x8xi32, #tpu.memory_space<vmem>>, %arg2: memref<128x128xf32, #tpu.memory_space<vmem>>, %arg3: memref<16x128xf32, #tpu.memory_space<vmem>>) attributes {dimension_semantics = [#tpu.dimension_semantics<parallel>], iteration_bounds = array<i64: 1>, scalar_prefetch = 0 : i64, scratch_operands = 0 : i64, tpu.core_type = #tpu.core_type<tc>, window_params = [{transform_indices = @transform_0, window_bounds = array<i64: 16, 8>}, {pipeline_mode = #tpu.pipeline_mode<synchronous>, transform_indices = @transform_1, window_bounds = array<i64: 128, 128>}, {transform_indices = @transform_2, window_bounds = array<i64: 16, 128>}]} {
    %c0 = arith.constant 0 : index
    %c0_0 = arith.constant 0 : index
    %0 = vector.load %arg1[%c0, %c0_0] : memref<16x8xi32, #tpu.memory_space<vmem>>, vector<16x8xi32>
    %1 = tpu.iota {dimensions = array<i32: 1>} : vector<16x128xi32>
    %cst = arith.constant 0.000000e+00 : f32
    %2 = vector.broadcast %cst : f32 to vector<16x128xf32>
    %3 = vector.extract_strided_slice %0 {offsets = [0, 0], sizes = [16, 1], strides = [1, 1]} : vector<16x8xi32> to vector<16x1xi32>
    %4 = vector.broadcast %3 : vector<16x1xi32> to vector<16x128xi32>
    %5 = arith.cmpi eq, %1, %4 : vector<16x128xi32>
    %6 = arith.extui %5 : vector<16x128xi1> to vector<16x128xi32>
    %7 = arith.sitofp %6 : vector<16x128xi32> to vector<16x128xf32>
    %8 = arith.addf %2, %7 : vector<16x128xf32>
    %9 = vector.extract_strided_slice %0 {offsets = [0, 1], sizes = [16, 1], strides = [1, 1]} : vector<16x8xi32> to vector<16x1xi32>
    %10 = vector.broadcast %9 : vector<16x1xi32> to vector<16x128xi32>
    %11 = arith.cmpi eq, %1, %10 : vector<16x128xi32>
    %12 = arith.extui %11 : vector<16x128xi1> to vector<16x128xi32>
    %13 = arith.sitofp %12 : vector<16x128xi32> to vector<16x128xf32>
    %14 = arith.addf %8, %13 : vector<16x128xf32>
    %15 = vector.extract_strided_slice %0 {offsets = [0, 2], sizes = [16, 1], strides = [1, 1]} : vector<16x8xi32> to vector<16x1xi32>
    %16 = vector.broadcast %15 : vector<16x1xi32> to vector<16x128xi32>
    %17 = arith.cmpi eq, %1, %16 : vector<16x128xi32>
    %18 = arith.extui %17 : vector<16x128xi1> to vector<16x128xi32>
    %19 = arith.sitofp %18 : vector<16x128xi32> to vector<16x128xf32>
    %20 = arith.addf %14, %19 : vector<16x128xf32>
    %21 = vector.extract_strided_slice %0 {offsets = [0, 3], sizes = [16, 1], strides = [1, 1]} : vector<16x8xi32> to vector<16x1xi32>
    %22 = vector.broadcast %21 : vector<16x1xi32> to vector<16x128xi32>
    %23 = arith.cmpi eq, %1, %22 : vector<16x128xi32>
    %24 = arith.extui %23 : vector<16x128xi1> to vector<16x128xi32>
    %25 = arith.sitofp %24 : vector<16x128xi32> to vector<16x128xf32>
    %26 = arith.addf %20, %25 : vector<16x128xf32>
    %27 = vector.extract_strided_slice %0 {offsets = [0, 4], sizes = [16, 1], strides = [1, 1]} : vector<16x8xi32> to vector<16x1xi32>
    %28 = vector.broadcast %27 : vector<16x1xi32> to vector<16x128xi32>
    %29 = arith.cmpi eq, %1, %28 : vector<16x128xi32>
    %30 = arith.extui %29 : vector<16x128xi1> to vector<16x128xi32>
    %31 = arith.sitofp %30 : vector<16x128xi32> to vector<16x128xf32>
    %32 = arith.addf %26, %31 : vector<16x128xf32>
    %33 = vector.extract_strided_slice %0 {offsets = [0, 5], sizes = [16, 1], strides = [1, 1]} : vector<16x8xi32> to vector<16x1xi32>
    %34 = vector.broadcast %33 : vector<16x1xi32> to vector<16x128xi32>
    %35 = arith.cmpi eq, %1, %34 : vector<16x128xi32>
    %36 = arith.extui %35 : vector<16x128xi1> to vector<16x128xi32>
    %37 = arith.sitofp %36 : vector<16x128xi32> to vector<16x128xf32>
    %38 = arith.addf %32, %37 : vector<16x128xf32>
    %c0_1 = arith.constant 0 : index
    %c0_2 = arith.constant 0 : index
    %39 = vector.load %arg2[%c0_1, %c0_2] : memref<128x128xf32, #tpu.memory_space<vmem>>, vector<128x128xf32>
    %cst_3 = arith.constant dense<0.000000e+00> : vector<16x128xf32>
    %40 = tpu.matmul %38, %39, %cst_3 {dimension_numbers = #tpu.dot_dimension_numbers<[1], [0], [0], [1], [0, 0, 1, 1], [], []>} : vector<16x128xf32>, vector<128x128xf32>, vector<16x128xf32> -> vector<16x128xf32>
    %c0_4 = arith.constant 0 : index
    %c0_5 = arith.constant 0 : index
    %41 = vector.load %arg3[%c0_4, %c0_5] : memref<16x128xf32, #tpu.memory_space<vmem>>, vector<16x128xf32>
    tpu.vector_store %arg3[%c0_4, %c0_5], %40 {strides = array<i32>} : memref<16x128xf32, #tpu.memory_space<vmem>>, vector<16x128xf32>,
    return
  }
  func.func @transform_0(%arg0: i32) -> (i32, i32) {
    %c0_i32 = arith.constant 0 : i32
    %c0_i32_0 = arith.constant 0 : i32
    return %arg0, %c0_i32 : i32, i32
  }
  func.func @transform_1(%arg0: i32) -> (i32, i32) {
    %c0_i32 = arith.constant 0 : i32
    %c0_i32_0 = arith.constant 0 : i32
    %c0_i32_1 = arith.constant 0 : i32
    return %c0_i32, %c0_i32_0 : i32, i32
  }
  func.func @transform_2(%arg0: i32) -> (i32, i32) {
    %c0_i32 = arith.constant 0 : i32
    %c0_i32_0 = arith.constant 0 : i32
    return %arg0, %c0_i32 : i32, i32
  }
}

</mosaic_0001>

<bundles_post_ra>
// kernel: _base_model_apply.1
= control target key start
LH: loop header
LB: loop body
LE: loop exit
PB: predicated region body
PF: predicated region fallthrough
CT: control target
= control target key end

     0   :  { %v311_v0 = vmov 0   ;;  %v312_v8 = vmov 1   ;;  %v313_v13 = vmov 2   ;;  %v314_v17 = vmov 3   ;;  %s393_s0 = inlined_call_operand.vmem [shape: s32[16,8], index: 0, kind: input, shape index: {}]   ;;  %s394_s1 = inlined_call_operand.vmem [shape: f32[128,128], index: 1, kind: input, shape index: {}]   ;;  %s395_s2 = inlined_call_operand.vmem [shape: f32[16,128], index: 2, kind: output, shape index: {}]  }
   0x1   :  { %302 = vset.pattern.permute.xlu1 %v311_v0  ;;  %300 = vset.pattern.permute.xlu0 %v311_v0  ;;  %v12_v1 = vld [vmem:[%s393_s0 + $0x8] sm:$0xff]  ;;  %v11_v2 = vld [vmem:[%s393_s0] sm:$0xff]  ;;  %v101_v6 = vld [vmem:[%s394_s1 + $0x10] sm:$0xff]  ;;  %v315_v18 = vmov 4   ;;  %v316_v22 = vmov 5   ;;  %v13_v35 = vlaneseq  ;;  %v317_v41 = vmov 0.0  }
   0x2   :  { %v99_v3 = vld [vmem:[%s394_s1] sm:$0xff]  ;;  %19 = vperm.xlu1 %302, %v12_v1   ;;  %16 = vperm.xlu0 %300, %v11_v2   ;;  %v100_v4 = vld [vmem:[%s394_s1 + $0x8] sm:$0xff]  ;;  %v102_v7 = vld [vmem:[%s394_s1 + $0x18] sm:$0xff] }
   0x3   :  { %v261_v5 = vpack.c.bf16 %v100_v4, %v99_v3  ;;  %v265_v9 = vpack.c.bf16 %v102_v7, %v101_v6  ;;  %v103_v10 = vld [vmem:[%s394_s1 + $0x20] sm:$0xff]  ;;  %v104_v11 = vld [vmem:[%s394_s1 + $0x28] sm:$0xff]  ;;  %v105_v14 = vld [vmem:[%s394_s1 + $0x30] sm:$0xff]  ;;  %v14_v38 = vand.u32 127, %v13_v35 }
   0x4   :  { %v269_v12 = vpack.c.bf16 %v104_v11, %v103_v10  ;;  %v106_v15 = vld [vmem:[%s394_s1 + $0x38] sm:$0xff]  ;;  %v107_v19 = vld [vmem:[%s394_s1 + $0x40] sm:$0xff]  ;;  %v108_v20 = vld [vmem:[%s394_s1 + $0x48] sm:$0xff] }
   0x5   :  { %262 = vmatprep.subr.bf16.mxu0 %v261_v5  ;;  %v273_v16 = vpack.c.bf16 %v106_v15, %v105_v14  ;;  %v277_v21 = vpack.c.bf16 %v108_v20, %v107_v19  ;;  %v109_v23 = vld [vmem:[%s394_s1 + $0x50] sm:$0xff]  ;;  %v110_v24 = vld [vmem:[%s394_s1 + $0x58] sm:$0xff]  ;;  %v111_v26 = vld [vmem:[%s394_s1 + $0x60] sm:$0xff] }
   0x6   :  { %303 = vset.pattern.permute.xlu1 %v312_v8  ;;  %301 = vset.pattern.permute.xlu0 %v312_v8  ;;  %v281_v25 = vpack.c.bf16 %v110_v24, %v109_v23  ;;  %v112_v27 = vld [vmem:[%s394_s1 + $0x68] sm:$0xff]  ;;  %v113_v29 = vld [vmem:[%s394_s1 + $0x70] sm:$0xff]  ;;  %v114_v30 = vld [vmem:[%s394_s1 + $0x78] sm:$0xff] }
   0x7   :  { %33 = vperm.xlu1 %303, %v12_v1   ;;  %30 = vperm.xlu0 %301, %v11_v2   ;;  %v285_v28 = vpack.c.bf16 %v112_v27, %v111_v26  ;;  %v289_v31 = vpack.c.bf16 %v114_v30, %v113_v29 }
   0x8   :  { %264 = vmatpush3.bf16.msra.mxu0 %v261_v5 }
   0x9   :  { %266 = vmatprep.subr.bf16.mxu0 %v265_v9 }
   0xb   :  { %304 = vset.pattern.permute.xlu1 %v313_v13  ;;  %305 = vset.pattern.permute.xlu0 %v313_v13 }
   0xc   :  { %44 = vperm.xlu1 %304, %v11_v2   ;;  %47 = vperm.xlu0 %305, %v12_v1  }
   0xd   :  { %268 = vmatpush3.bf16.msra.mxu0 %v265_v9 }
   0xe   :  { %270 = vmatprep.subr.bf16.mxu0 %v269_v12 }
  0x10   :  { %306 = vset.pattern.permute.xlu1 %v314_v17  ;;  %307 = vset.pattern.permute.xlu0 %v315_v18 }
  0x11   :  { %58 = vperm.xlu1 %306, %v11_v2   ;;  %72 = vperm.xlu0 %307, %v11_v2  }
  0x12   :  { %272 = vmatpush3.bf16.msra.mxu0 %v269_v12 }
  0x13   :  { %274 = vmatprep.subr.bf16.mxu0 %v273_v16 }
  0x15   :  { %61 = vperm.xlu1 %306, %v12_v1   ;;  %310 = vset.pattern.permute.xlu0 %v316_v22 }
  0x16   :  { %89 = vperm.xlu0 %310, %v12_v1   ;;  %276 = vmatpush3.bf16.msra.mxu0 %v273_v16 }
  0x17   :  { %278 = vmatprep.subr.bf16.mxu0 %v277_v21 }
  0x19   :  { %308 = vset.pattern.permute.xlu1 %v315_v18 }
  0x1a   :  { %75 = vperm.xlu1 %308, %v12_v1   ;;  %280 = vmatpush3.bf16.msra.mxu0 %v277_v21 }
  0x1b   :  { %282 = vmatprep.subr.bf16.mxu0 %v281_v25 }
  0x1e   :  { %309 = vset.pattern.permute.xlu1 %v316_v22  ;;  %284 = vmatpush3.bf16.msra.mxu0 %v281_v25 }
  0x1f   :  { %86 = vperm.xlu1 %309, %v11_v2   ;;  %286 = vmatprep.subr.bf16.mxu0 %v285_v28 }
  0x22   :  { %288 = vmatpush3.bf16.msra.mxu0 %v285_v28 }
  0x23   :  { %290 = vmatprep.subr.bf16.mxu0 %v289_v31 }
  0x26   :  { %292 = vmatpush3.bf16.msra.mxu0 %v289_v31 }
  0x81   :  { %v20_v32 = vpop.permute.xlu1 %19  ;;  %v17_v33 = vpop.permute.xlu0 %16 }
  0x82   :  { %vm21_vm0 = vcmp.eq.s32.totalorder %v14_v38, %v17_v33  ;;  %vm22_vm4 = vcmp.eq.s32.totalorder %v14_v38, %v20_v32 }
  0x83   :  { %v196_v42 = vsel %vm21_vm0, 1.0, %v317_v41  ;;  %v197_v49 = vsel %vm22_vm4, 1.0, %v317_v41 }
  0x86   :  { %v34_v34 = vpop.permute.xlu1 %33  ;;  %v31_v36 = vpop.permute.xlu0 %30 }
  0x87   :  { %vm35_vm1 = vcmp.eq.s32.totalorder %v14_v38, %v31_v36  ;;  %vm36_vm2 = vcmp.eq.s32.totalorder %v14_v38, %v34_v34 }
  0x88   :  { %v198_v43 = vsel %vm35_vm1, 1.0, %v317_v41  ;;  %v199_v45 = vsel %vm36_vm2, 1.0, %v317_v41 }
  0x89   :  { %v41_v46 = vadd.f32 %v198_v43, %v196_v42  ;;  %v42_v51 = vadd.f32 %v199_v45, %v197_v49 }
  0x8b   :  { %v45_v37 = vpop.permute.xlu1 %44  ;;  %v48_v40 = vpop.permute.xlu0 %47 }
  0x8c   :  { %vm49_vm3 = vcmp.eq.s32.totalorder %v14_v38, %v45_v37  ;;  %vm50_vm5 = vcmp.eq.s32.totalorder %v14_v38, %v48_v40 }
  0x8d   :  { %v200_v48 = vsel %vm49_vm3, 1.0, %v317_v41  ;;  %v201_v50 = vsel %vm50_vm5, 1.0, %v317_v41 }
  0x8e   :  { %v55_v53 = vadd.f32 %v200_v48, %v41_v46  ;;  %v56_v57 = vadd.f32 %v201_v50, %v42_v51 }
  0x90   :  { %v59_v39 = vpop.permute.xlu1 %58  ;;  %v73_v47 = vpop.permute.xlu0 %72 }
  0x91   :  { %vm63_vm6 = vcmp.eq.s32.totalorder %v14_v38, %v59_v39  ;;  %vm77_vm8 = vcmp.eq.s32.totalorder %v14_v38, %v73_v47 }
  0x92   :  { %v202_v52 = vsel %vm63_vm6, 1.0, %v317_v41  ;;  %v204_v60 = vsel %vm77_vm8, 1.0, %v317_v41 }
  0x93   :  { %v69_v58 = vadd.f32 %v202_v52, %v55_v53 }
  0x94   :  { %v62_v44 = vpop.permute.xlu1 %61 }
  0x95   :  { %vm64_vm7 = vcmp.eq.s32.totalorder %v14_v38, %v62_v44  ;;  %v90_v56 = vpop.permute.xlu0 %89  ;;  %v83_v1 = vadd.f32 %v204_v60, %v69_v58 }
  0x96   :  { %v203_v54 = vsel %vm64_vm7, 1.0, %v317_v41  ;;  %vm92_vm10 = vcmp.eq.s32.totalorder %v14_v38, %v90_v56 }
  0x97   :  { %v70_v61 = vadd.f32 %v203_v54, %v56_v57  ;;  %v207_v0 = vsel %vm92_vm10, 1.0, %v317_v41 }
  0x99   :  { %v76_v55 = vpop.permute.xlu1 %75 }
  0x9a   :  { %vm78_vm9 = vcmp.eq.s32.totalorder %v14_v38, %v76_v55 }
  0x9b   :  { %v205_v59 = vsel %vm78_vm9, 1.0, %v317_v41 }
  0x9c   :  { %v84_v62 = vadd.f32 %v205_v59, %v70_v61 }
  0x9e   :  { %v87_v63 = vpop.permute.xlu1 %86  ;;  %v98_v4 = vadd.f32 %v207_v0, %v84_v62 }
  0x9f   :  { %vm91_vm11 = vcmp.eq.s32.totalorder %v14_v38, %v87_v63 }
  0xa0   :  { %v206_v2 = vsel %vm91_vm11, 1.0, %v317_v41 }
  0xa1   :  { %v97_v3 = vadd.f32 %v206_v2, %v83_v1 }
  0xa3   :  { %258 = vmatprep.mubr.f32.mxu0 %v97_v3 }
  0xa4   :  { %259 = vmatmul.mubr.f32.vlgmr.msra.gmra.mrb[0].mxu0 %v98_v4 }
 0x177   :  { %v260_v5 = vpop.f32.mrb[0].mxu0 }
 0x178   :  { %191 = vst [vmem:[%s395_s2 + $0x8] sm:$0xff] %v260_v5  ;;  %v181_v6 = vpop.f32.mrb[1].mxu0 }
 0x179   :  { %190 = vst [vmem:[%s395_s2] sm:$0xff] %v181_v6 }

</bundles_post_ra>
